<compile_context>
chip_gen: v5e
topology: v5e:2x2
jax: 0.10.0
libtpu: 0.0.40
codegen_flags: <defaults>
</compile_context>

<pallas_src>
import functools

import jax
import jax.numpy as jnp
from jax import lax
from jax.experimental import pallas as pl
from jax.experimental.pallas import tpu as pltpu

LANES = 128
SUBLANES = 8


def _cdiv(a: int, b: int) -> int:
    return -(-a // b)


def _round_up(a: int, m: int) -> int:
    return _cdiv(a, m) * m


def _tpu_config():
    """Returns (num_splits, default_block_rows) for the local TPU generation."""
    kind = ""
    try:
        kind = jax.devices()[0].device_kind.lower()
    except Exception:  # pragma: no cover - defensive; fall back to safe config
        pass
    if "v7" in kind:
        # 2 TensorCores/chip, ~3.2 TB/s HBM: shard the reduction across cores
        # and use big tiles so the 0.35us/step overhead is <10% of step time.
        return 2, 8192
    if "v6" in kind:
        # 1 TC; 12 MiB double-buffered footprint stays well under the 32 MiB
        # scoped-VMEM default.
        return 1, 4096
    # v5e and unknown chips: 6 MiB footprint, safely under the 16 MiB default.
    return 1, 2048


def _wmse_kernel(x_ref, t_ref, w_ref, out_ref, acc_ref, *,
                 rows_valid: int, blocks_per_split: int, block_rows: int):
    c = pl.program_id(0)   # split axis ("parallel"; shards across TCs on v7x)
    i = pl.program_id(1)   # reduction axis ("arbitrary")

    # Zero the vector accumulator at the start of each split's reduction.
    @pl.when(i == 0)
    def _():
        acc_ref[...] = jnp.zeros_like(acc_ref)

    x = x_ref[...].astype(jnp.float32)
    t = t_ref[...].astype(jnp.float32)
    w = w_ref[...].astype(jnp.float32)
    diff = x - t
    wsq = w * diff * diff

    # Mask rows past the true extent (partial / overhanging last block).
    # jnp.where on the product is used (NOT masking w and multiplying) because
    # the uninitialized tail of a partial block may contain NaN/Inf and
    # 0 * inf == nan would poison the accumulator.
    row_start = (c * blocks_per_split + i) * block_rows
    row_ids = row_start + lax.broadcasted_iota(jnp.int32, wsq.shape, 0)
    wsq = jnp.where(row_ids < rows_valid, wsq, 0.0)

    # Fold the (tr, 128) tile into the (8, 128) accumulator with pure VPU adds;
    # no per-step cross-lane reduce, no scalar loop-carried dependency.
    acc_ref[...] += wsq.reshape(-1, SUBLANES, LANES).sum(axis=0)

    # Emit the lane-dense (8,128) partial sum once, on the last step of this
    # split; the cheap final reduce happens in the wrapper.
    @pl.when(i == pl.num_programs(1) - 1)
    def _():
        out_ref[...] = acc_ref[...]


def weighted_mse_loss(x, target, weights, *, block_rows: int | None = None,
                      min_pallas_elements: int = 1 << 20):
    """Computes mean(weights * (x - target)**2) with a Pallas TPU kernel."""
    assert x.shape == target.shape == weights.shape
    total = int(x.size)
    assert total > 0
    out_dtype = jnp.result_type(x.dtype, target.dtype, weights.dtype)

    # Small-input fast path: fixed launch + pipeline-prologue overhead beats a
    # fused XLA reduction for tiny tensors.
    if total < min_pallas_elements:
        xf = x.astype(jnp.float32)
        tf = target.astype(jnp.float32)
        wf = weights.astype(jnp.float32)
        d = xf - tf
        return (jnp.sum(wf * d * d) / total).astype(out_dtype)

    splits, default_rows = _tpu_config()

    rows_valid = _cdiv(total, LANES)          # rows that hold real data
    slab_rows = max(rows_valid, SUBLANES)     # slab height (>= one (8,128) tile)

    # Tile rows: multiple of 8 sublanes, no larger than the slab or than one
    # split's share of it (so blocks never exceed the array extent).
    requested = block_rows if block_rows is not None else default_rows
    tr = min(_round_up(max(requested, SUBLANES), SUBLANES),
             _round_up(_cdiv(slab_rows, splits), SUBLANES),
             (slab_rows // SUBLANES) * SUBLANES)
    tr = max(tr, SUBLANES)

    nblocks = _cdiv(slab_rows, tr)
    if nblocks < splits:
        splits = 1
    blocks_per_split = _cdiv(nblocks, splits)

    # Lane-dense slab.  The reshape of a contiguous array is a free bitcast;
    # jnp.pad (a real HBM copy) only fires when total is not a multiple of 128
    # or the input is tiny, and pads at most (8*128 - 1) elements.
    slab_elems = slab_rows * LANES

    def to_slab(a):
        flat = a.reshape(-1)
        if slab_elems != total:
            flat = jnp.pad(flat, (0, slab_elems - total))
        return flat.reshape(slab_rows, LANES)

    x2, t2, w2 = to_slab(x), to_slab(target), to_slab(weights)

    if nblocks % splits == 0:
        def in_index_map(c, i):
            return (c * blocks_per_split + i, 0)
    else:
        # Overhanging blocks of the last split are clamped to a valid block;
        # their contribution is masked to zero inside the kernel.
        def in_index_map(c, i):
            return (jnp.minimum(c * blocks_per_split + i, nblocks - 1), 0)

    in_spec = pl.BlockSpec((tr, LANES), in_index_map)
    out_spec = pl.BlockSpec((SUBLANES, LANES), lambda c, i: (c, 0))

    kernel = functools.partial(
        _wmse_kernel, rows_valid=rows_valid,
        blocks_per_split=blocks_per_split, block_rows=tr)

    # VMEM budget: 3 double-buffered input tiles + outputs + scratch + slack.
    in_bytes = sum(2 * tr * LANES * a.dtype.itemsize for a in (x2, t2, w2))
    out_bytes = 2 * splits * SUBLANES * LANES * 4 + SUBLANES * LANES * 4
    vmem_limit = max(in_bytes + out_bytes + (4 << 20), 32 << 20)

    partials = pl.pallas_call(
        kernel,
        out_shape=jax.ShapeDtypeStruct((splits * SUBLANES, LANES), jnp.float32),
        grid_spec=pltpu.PrefetchScalarGridSpec(
            num_scalar_prefetch=0,
            grid=(splits, blocks_per_split),
            in_specs=[in_spec, in_spec, in_spec],
            out_specs=out_spec,
            scratch_shapes=[pltpu.VMEM((SUBLANES, LANES), jnp.float32)],
        ),
        compiler_params=pltpu.CompilerParams(
            dimension_semantics=("parallel", "arbitrary"),
            vmem_limit_bytes=int(vmem_limit),
        ),
    )(x2, t2, w2)

    # Final cross-lane/sublane reduce in the wrapper; divide by the TRUE count.
    # NOTE: f32 accumulation per (sublane, lane) cell; adequate for typical
    # sizes (review: acceptable, revisit only for extremely large inputs).
    return (jnp.sum(partials) / total).astype(out_dtype)


if __name__ == "__main__":
    key = jax.random.PRNGKey(0)
    ks = jax.random.split(key, 12)

    def ref_loss(a, b, c):
        af, bf, cf = (v.astype(jnp.float32) for v in (a, b, c))
        return jnp.mean(cf * (af - bf) ** 2)

    # 1) Main check: small NCHW conv-style input (2*4*16*16 = 2048 elements),
    #    forced onto the Pallas path (min_pallas_elements=0).
    B, C, H, W = 2, 4, 16, 16
    x = jax.random.normal(ks[0], (B, C, H, W), dtype=jnp.float32)
    t = jax.random.normal(ks[1], (B, C, H, W), dtype=jnp.float32)
    w = jax.random.uniform(ks[2], (B, C, H, W), dtype=jnp.float32)
    loss = jax.block_until_ready(weighted_mse_loss(x, t, w, min_pallas_elements=0))
    ref = ref_loss(x, t, w)
    assert jnp.allclose(loss, ref, rtol=1e-5, atol=1e-6), (loss, ref)

    # 2) Ragged shape (210 elements, not a multiple of 128): exercises the
    #    tiny tail-pad path.
    xr = jax.random.normal(ks[3], (2, 3, 7, 5), dtype=jnp.float32)
    tr_ = jax.random.normal(ks[4], (2, 3, 7, 5), dtype=jnp.float32)
    wr = jax.random.uniform(ks[5], (2, 3, 7, 5), dtype=jnp.float32)
    loss_r = jax.block_until_ready(
        weighted_mse_loss(xr, tr_, wr, min_pallas_elements=0))
    ref_r = ref_loss(xr, tr_, wr)
    assert jnp.allclose(loss_r, ref_r, rtol=1e-5, atol=1e-6), (loss_r, ref_r)

    # 3) Multi-block reduction with a partial last block (2496 rows, 1024-row
    #    tiles): exercises the in-kernel row masking with NO jnp.pad copy.
    shape3 = (8, 13, 24, 128)   # 319488 elements = 2496 lane-rows
    x3 = jax.random.normal(ks[6], shape3, dtype=jnp.float32)
    t3 = jax.random.normal(ks[7], shape3, dtype=jnp.float32)
    w3 = jax.random.uniform(ks[8], shape3, dtype=jnp.float32)
    loss3 = jax.block_until_ready(
        weighted_mse_loss(x3, t3, w3, block_rows=1024, min_pallas_elements=0))
    ref3 = ref_loss(x3, t3, w3)
    assert jnp.allclose(loss3, ref3, rtol=1e-5, atol=1e-6), (loss3, ref3)

    # 4) Native bf16 streaming (halves HBM bytes for the bandwidth-bound loop;
    #    accumulation stays f32 in-kernel).
    shape4 = (4, 8, 32, 96)     # 98304 elements = 768 lane-rows
    x4 = jax.random.normal(ks[9], shape4, dtype=jnp.bfloat16)
    t4 = jax.random.normal(ks[10], shape4, dtype=jnp.bfloat16)
    w4 = jax.random.uniform(ks[11], shape4, dtype=jnp.bfloat16)
    loss4 = jax.block_until_ready(
        weighted_mse_loss(x4, t4, w4, block_rows=256, min_pallas_elements=0))
    ref4 = ref_loss(x4, t4, w4)
    assert jnp.allclose(loss4.astype(jnp.float32), ref4, rtol=3e-2, atol=1e-3), (
        loss4, ref4)

    print("KERNEL_OK")
</pallas_src>

<mosaic_0001>
module attributes {stable_mosaic.version = 11 : i64} {
  func.func @_wmse_kernel(%arg0: i32, %arg1: i32, %arg2: memref<16x128xf32, #tpu.memory_space<vmem>>, %arg3: memref<16x128xf32, #tpu.memory_space<vmem>>, %arg4: memref<16x128xf32, #tpu.memory_space<vmem>>, %arg5: memref<8x128xf32, #tpu.memory_space<vmem>>, %arg6: memref<8x128xf32, #tpu.memory_space<vmem>>) attributes {dimension_semantics = [#tpu.dimension_semantics<parallel>, #tpu.dimension_semantics<arbitrary>], iteration_bounds = array<i64: 1, 1>, scalar_prefetch = 0 : i64, scratch_operands = 1 : i64, tpu.core_type = #tpu.core_type<tc>, window_params = [{transform_indices = @transform_0, window_bounds = array<i64: 16, 128>}, {transform_indices = @transform_1, window_bounds = array<i64: 16, 128>}, {transform_indices = @transform_2, window_bounds = array<i64: 16, 128>}, {transform_indices = @transform_3, window_bounds = array<i64: 8, 128>}]} {
    %c0_i32 = arith.constant 0 : i32
    %0 = arith.cmpi eq, %arg1, %c0_i32 : i32
    %1 = arith.extui %0 : i1 to i32
    %c0_i32_0 = arith.constant 0 : i32
    %2 = arith.cmpi ne, %1, %c0_i32_0 : i32
    scf.if %2 {
      %cst_14 = arith.constant 0.000000e+00 : f32
      %27 = vector.broadcast %cst_14 : f32 to vector<8x128xf32>
      %c0_15 = arith.constant 0 : index
      %c0_16 = arith.constant 0 : index
      %28 = vector.load %arg6[%c0_15, %c0_16] : memref<8x128xf32, #tpu.memory_space<vmem>>, vector<8x128xf32>
      tpu.vector_store %arg6[%c0_15, %c0_16], %27 {strides = array<i32>} : memref<8x128xf32, #tpu.memory_space<vmem>>, vector<8x128xf32>,
    } else {
    }
    %c0 = arith.constant 0 : index
    %c0_1 = arith.constant 0 : index
    %3 = vector.load %arg2[%c0, %c0_1] : memref<16x128xf32, #tpu.memory_space<vmem>>, vector<16x128xf32>
    %c0_2 = arith.constant 0 : index
    %c0_3 = arith.constant 0 : index
    %4 = vector.load %arg3[%c0_2, %c0_3] : memref<16x128xf32, #tpu.memory_space<vmem>>, vector<16x128xf32>
    %c0_4 = arith.constant 0 : index
    %c0_5 = arith.constant 0 : index
    %5 = vector.load %arg4[%c0_4, %c0_5] : memref<16x128xf32, #tpu.memory_space<vmem>>, vector<16x128xf32>
    %6 = arith.subf %3, %4 : vector<16x128xf32>
    %7 = arith.mulf %5, %6 : vector<16x128xf32>
    %8 = arith.mulf %7, %6 : vector<16x128xf32>
    %c1_i32 = arith.constant 1 : i32
    %9 = arith.muli %arg0, %c1_i32 : i32
    %10 = arith.addi %9, %arg1 : i32
    %c16_i32 = arith.constant 16 : i32
    %11 = arith.muli %10, %c16_i32 : i32
    %12 = tpu.iota {dimensions = array<i32: 0>} : vector<16x128xi32>
    %13 = vector.broadcast %11 : i32 to vector<16x128xi32>
    %14 = arith.addi %13, %12 : vector<16x128xi32>
    %c16_i32_6 = arith.constant 16 : i32
    %15 = vector.broadcast %c16_i32_6 : i32 to vector<16x128xi32>
    %16 = arith.cmpi slt, %14, %15 : vector<16x128xi32>
    %cst = arith.constant 0.000000e+00 : f32
    %17 = vector.broadcast %cst : f32 to vector<16x128xf32>
    %18 = arith.select %16, %8, %17 : vector<16x128xi1>, vector<16x128xf32>
    %c0_7 = arith.constant 0 : index
    %c0_8 = arith.constant 0 : index
    %19 = vector.load %arg6[%c0_7, %c0_8] : memref<8x128xf32, #tpu.memory_space<vmem>>, vector<8x128xf32>
    %20 = vector.shape_cast %18 : vector<16x128xf32> to vector<2x8x128xf32>
    %cst_9 = arith.constant dense<0.000000e+00> : vector<8x128xf32>
    %21 = vector.multi_reduction <add>, %20, %cst_9 [0] : vector<2x8x128xf32> to vector<8x128xf32>
    %22 = arith.addf %19, %21 : vector<8x128xf32>
    %c0_10 = arith.constant 0 : index
    %c0_11 = arith.constant 0 : index
    %23 = vector.load %arg6[%c0_10, %c0_11] : memref<8x128xf32, #tpu.memory_space<vmem>>, vector<8x128xf32>
    tpu.vector_store %arg6[%c0_10, %c0_11], %22 {strides = array<i32>} : memref<8x128xf32, #tpu.memory_space<vmem>>, vector<8x128xf32>,
    %c0_i32_12 = arith.constant 0 : i32
    %24 = arith.cmpi eq, %arg1, %c0_i32_12 : i32
    %25 = arith.extui %24 : i1 to i32
    %c0_i32_13 = arith.constant 0 : i32
    %26 = arith.cmpi ne, %25, %c0_i32_13 : i32
    scf.if %26 {
      %c0_14 = arith.constant 0 : index
      %c0_15 = arith.constant 0 : index
      %27 = vector.load %arg6[%c0_14, %c0_15] : memref<8x128xf32, #tpu.memory_space<vmem>>, vector<8x128xf32>
      %c0_16 = arith.constant 0 : index
      %c0_17 = arith.constant 0 : index
      %28 = vector.load %arg5[%c0_16, %c0_17] : memref<8x128xf32, #tpu.memory_space<vmem>>, vector<8x128xf32>
      tpu.vector_store %arg5[%c0_16, %c0_17], %27 {strides = array<i32>} : memref<8x128xf32, #tpu.memory_space<vmem>>, vector<8x128xf32>,
    } else {
    }
    return
  }
  func.func @transform_0(%arg0: i32, %arg1: i32) -> (i32, i32) {
    %c1_i32 = arith.constant 1 : i32
    %0 = arith.muli %arg0, %c1_i32 : i32
    %1 = arith.addi %0, %arg1 : i32
    %c0_i32 = arith.constant 0 : i32
    %c0_i32_0 = arith.constant 0 : i32
    return %1, %c0_i32 : i32, i32
  }
  func.func @transform_1(%arg0: i32, %arg1: i32) -> (i32, i32) {
    %c1_i32 = arith.constant 1 : i32
    %0 = arith.muli %arg0, %c1_i32 : i32
    %1 = arith.addi %0, %arg1 : i32
    %c0_i32 = arith.constant 0 : i32
    %c0_i32_0 = arith.constant 0 : i32
    return %1, %c0_i32 : i32, i32
  }
  func.func @transform_2(%arg0: i32, %arg1: i32) -> (i32, i32) {
    %c1_i32 = arith.constant 1 : i32
    %0 = arith.muli %arg0, %c1_i32 : i32
    %1 = arith.addi %0, %arg1 : i32
    %c0_i32 = arith.constant 0 : i32
    %c0_i32_0 = arith.constant 0 : i32
    return %1, %c0_i32 : i32, i32
  }
  func.func @transform_3(%arg0: i32, %arg1: i32) -> (i32, i32) {
    %c0_i32 = arith.constant 0 : i32
    %c0_i32_0 = arith.constant 0 : i32
    return %arg0, %c0_i32 : i32, i32
  }
}

</mosaic_0001>

<bundles_post_ra>
// kernel: tpu_custom_call.1
= control target key start
LH: loop header
LB: loop body
LE: loop exit
PB: predicated region body
PF: predicated region fallthrough
CT: control target
= control target key end

     0   :  { %8 = vsyncpa [#allocation4], 0  ;;  %s282_s0 = inlined_call_operand.hbm [shape: f32[16,128], index: 0, kind: input, shape index: {}]   ;;  %s283_s1 = inlined_call_operand.hbm [shape: f32[16,128], index: 1, kind: input, shape index: {}]   ;;  %s284_s2 = inlined_call_operand.hbm [shape: f32[16,128], index: 2, kind: input, shape index: {}]   ;;  %s285_s3 = inlined_call_operand.hbm [shape: f32[8,128], index: 3, kind: output, shape index: {}]  }
   0x1   :  { %9 = vsyncpa [#allocation7], 0 }
   0x2   :  { %10 = vsyncpa [#allocation5], 0  ;;  %s36_s14 = sshll.u32 %s283_s1, 4  ;;  %s244_s15 = smov [#allocation6]   ;;  %s37_s14 = int_to_ptr.hbm [resolvable:$true] %s36_s14 }
   0x3   :  { %s38_s16 = sshll.u32 %s244_s15, 4  ;;  %s19_s19 = sshll.u32 %s282_s0, 4  ;;  %s39_s16 = int_to_ptr.vmem [resolvable:$true] %s38_s16  ;;  %s20_s19 = int_to_ptr.hbm [resolvable:$true] %s19_s19 }
   0x4   :  { %s245_s20 = smov 128   ;;  %s246_s21 = smov 8  }
   0x5   :  { %44 = dma.hbm_to_vmem [thread:$0]  %s37_s14, 256, %s39_s16, [#allocation7], %s245_s20, %s245_s20, %s246_s21  }
   0x6   :  { %s247_s22 = smov [#allocation3]   ;;  %s53_s26 = sshll.u32 %s284_s2, 4  ;;  %s54_s26 = int_to_ptr.hbm [resolvable:$true] %s53_s26 }
   0x7   :  { %s21_s23 = sshll.u32 %s247_s22, 4  ;;  %s248_s1 = smov [#allocation8]   ;;  %s22_s23 = int_to_ptr.vmem [resolvable:$true] %s21_s23 }
   0x8   :  { %27 = dma.hbm_to_vmem [thread:$0]  %s20_s19, 256, %s22_s23, [#allocation4], %s245_s20, %s245_s20, %s246_s21  }
   0x9   :  { %s55_s27 = sshll.u32 %s248_s1, 4  ;;  %s56_s27 = int_to_ptr.vmem [resolvable:$true] %s55_s27 }
   0xa   :  { %61 = dma.hbm_to_vmem [thread:$0]  %s54_s26, 256, %s56_s27, [#allocation7], %s245_s20, %s245_s20, %s246_s21  }
   0xb   :  { %238 = dma.done.wait [#allocation4], 256  }
   0xc   :  { %239 = vsyncadd [#allocation4], 4294967040 }
   0xd   :  { %240 = dma.done.wait [#allocation7], 512  }
   0xe   :  { %241 = vsyncadd [#allocation7], 4294966784  ;;  %v85_v0 = vld [vmem:[#allocation3] sm:$0xff]  ;;  %v86_v1 = vld [vmem:[#allocation3 + $0x8] sm:$0xff]  ;;  %s249_s0 = smov [#allocation9]   ;;  %s125_s30 = sshll.u32 %s285_s3, 4  ;;  %s126_s30 = int_to_ptr.hbm [resolvable:$true] %s125_s30 }
   0xf   :  { %v87_v2 = vld [vmem:[#allocation6] sm:$0xff]  ;;  %v88_v3 = vld [vmem:[#allocation6 + $0x8] sm:$0xff]  ;;  %v89_v4 = vld [vmem:[#allocation8] sm:$0xff]  ;;  %s123_s2 = sshll.u32 %s249_s0, 4  ;;  %s124_s2 = int_to_ptr.vmem [resolvable:$true] %s123_s2 }
  0x10   :  { %v90_v5 = vld [vmem:[#allocation8 + $0x8] sm:$0xff]  ;;  %v91_v6 = vsub.f32 %v85_v0, %v87_v2  ;;  %v92_v7 = vsub.f32 %v86_v1, %v88_v3 }
  0x12   :  { %v93_v8 = vmul.f32 %v91_v6, %v89_v4  ;;  %v94_v9 = vmul.f32 %v92_v7, %v90_v5 }
  0x14   :  { %v95_v10 = vmul.f32 %v93_v8, %v91_v6  ;;  %v96_v11 = vmul.f32 %v94_v9, %v92_v7 }
  0x16   :  { %v110_v12 = vadd.f32 %v96_v11, %v95_v10 }
  0x18   :  { %117 = vst [vmem:[#allocation9] sm:$0xff] %v110_v12 }
  0x19   :  { %128 = dma.vmem_to_hbm [thread:$0]  %s124_s2, 128, %s126_s30, [#allocation5]  }
  0x1a   :  { %242 = dma.done.wait [#allocation5], 128  }
  0x1b   :  { %243 = vsyncadd [#allocation5], 4294967168 }
  0x1c   :  { %133 = vsyncpa [#allocation4], 1 }
  0x1d   :  { %134 = vsyncpa [#allocation7], 1 }
  0x1e   :  { %135 = vsyncpa [#allocation5], 1 }

</bundles_post_ra>
